<compile_context>
chip_gen: v6e
topology: v6e:2x2x1
jax: 0.10.0
libtpu: 0.0.40
codegen_flags: <defaults>
</compile_context>

<pallas_src>
import math

import jax
import jax.numpy as jnp
from jax.experimental import pallas as pl
from jax.experimental.pallas import tpu as pltpu


def _round_up(x, m):
    return (x + m - 1) // m * m


# -----------------------------------------------------------------------------
# Pallas tiled matmul: (M, K) @ (K, N) -> (M, N), f32 accumulation on the MXU.
# -----------------------------------------------------------------------------
def _matmul_kernel(a_ref, b_ref, o_ref, acc_ref):
    @pl.when(pl.program_id(2) == 0)
    def _init():
        acc_ref[...] = jnp.zeros_like(acc_ref)

    acc_ref[...] += jnp.dot(a_ref[...], b_ref[...],
                            preferred_element_type=jnp.float32)

    @pl.when(pl.program_id(2) == pl.num_programs(2) - 1)
    def _store():
        o_ref[...] = acc_ref[...].astype(o_ref.dtype)


def pallas_matmul(a, b):
    """a: (M, K), b: (K, N) -> (M, N). Pads to lane/sublane-aligned tiles."""
    m, k = a.shape
    k2, n = b.shape
    assert k == k2
    out_dtype = a.dtype

    # Tiles: multiples of (8, 128); capped so each grid step is a few MiB max
    # (safe within v7x's smaller scoped VMEM while large enough to hide the
    # ~0.35 us per-grid-step overhead).
    tm = min(256, _round_up(m, 8))
    tn = min(256, _round_up(n, 128))
    tk = min(512, _round_up(k, 128))

    mp, np_, kp = _round_up(m, tm), _round_up(n, tn), _round_up(k, tk)

    a_p = jnp.pad(a, ((0, mp - m), (0, kp - k)))
    b_p = jnp.pad(b, ((0, kp - k), (0, np_ - n)))

    out_p = pl.pallas_call(
        _matmul_kernel,
        out_shape=jax.ShapeDtypeStruct((mp, np_), out_dtype),
        grid_spec=pltpu.PrefetchScalarGridSpec(
            num_scalar_prefetch=0,
            grid=(mp // tm, np_ // tn, kp // tk),
            in_specs=[
                pl.BlockSpec((tm, tk), lambda i, j, kk: (i, kk)),
                pl.BlockSpec((tk, tn), lambda i, j, kk: (kk, j)),
            ],
            out_specs=pl.BlockSpec((tm, tn), lambda i, j, kk: (i, j)),
            scratch_shapes=[pltpu.VMEM((tm, tn), jnp.float32)],
        ),
        compiler_params=pltpu.CompilerParams(
            dimension_semantics=("parallel", "parallel", "arbitrary"),
        ),
        cost_estimate=pl.CostEstimate(
            flops=2 * mp * np_ * kp,
            transcendentals=0,
            bytes_accessed=4 * (mp * kp + kp * np_ + mp * np_),
        ),
    )(a_p, b_p)

    return out_p[:m, :n]


# -----------------------------------------------------------------------------
# D4 weight expansion (plain JAX glue; tiny tensor, pure index shuffling).
# -----------------------------------------------------------------------------
def expand_d4_weight(weight):
    """(O, I, 8, 3, 3) -> (O*8, I*8, 3, 3): the 8 dihedral-group transforms."""
    def tf(perm, transpose, k):
        t = weight[:, :, jnp.array(perm)]
        if transpose:
            t = jnp.swapaxes(t, 3, 4)
        return jnp.rot90(t, k, axes=(3, 4))

    slots = [
        tf((0, 1, 2, 3, 4, 5, 6, 7), False, 0),
        tf((3, 0, 1, 2, 5, 6, 7, 4), False, 1),
        tf((2, 3, 0, 1, 6, 7, 4, 5), False, 2),
        tf((1, 2, 3, 0, 7, 4, 5, 6), False, 3),
        tf((4, 5, 6, 7, 0, 1, 2, 3), True, 3),
        tf((5, 6, 7, 4, 3, 0, 1, 2), True, 2),
        tf((6, 7, 4, 5, 2, 3, 0, 1), True, 1),
        tf((7, 4, 5, 6, 1, 2, 3, 0), True, 0),
    ]
    w_full = jnp.stack(slots, axis=1)                 # (O, 8, I, 8, 3, 3)
    o, i = w_full.shape[0], w_full.shape[2]
    return w_full.reshape(o * 8, i * 8, 3, 3)


def _im2col_3x3(x_nchw):
    """(B, C, H, W) -> (B*H*W, 9*C) 3x3 patches (padding=1), tap-major order."""
    b, c, h, w = x_nchw.shape
    x_nhwc = jnp.transpose(x_nchw, (0, 2, 3, 1))
    x_pad = jnp.pad(x_nhwc, ((0, 0), (1, 1), (1, 1), (0, 0)))
    taps = [x_pad[:, kh:kh + h, kw:kw + w, :]
            for kh in range(3) for kw in range(3)]
    patches = jnp.stack(taps, axis=3)                 # (B, H, W, 9, C)
    return patches.reshape(b * h * w, 9 * c)


# -----------------------------------------------------------------------------
# Full forward pass of D_4_3x3.
# -----------------------------------------------------------------------------
def d4_3x3_forward(x, weight, bias=None, stride=1):
    """x: (B, in_ch*8, H, W), weight: (out_ch, in_ch, 8, 3, 3)."""
    b, cin8, h, w = x.shape
    out_ch = weight.shape[0]
    cout8 = out_ch * 8
    assert cin8 == weight.shape[1] * 8, "x channels must be in_channels*8"

    w_full = expand_d4_weight(weight)                         # (Cout8, Cin8, 3, 3)

    # conv2d(padding=1) == im2col GEMM; the GEMM runs in the Pallas kernel.
    a = _im2col_3x3(x)                                        # (B*H*W, 9*Cin8)
    w_mat = jnp.transpose(w_full, (2, 3, 1, 0)).reshape(9 * cin8, cout8)
    y = pallas_matmul(a, w_mat)                               # (B*H*W, Cout8)
    y = y.reshape(b, h, w, cout8).transpose(0, 3, 1, 2)       # (B, Cout8, H, W)

    if stride != 1:
        # nn.MaxPool2d(2, 2), floor mode — plain JAX glue (off by default).
        hh, ww = (h // 2) * 2, (w // 2) * 2
        y = (y[:, :, :hh, :ww]
             .reshape(b, cout8, hh // 2, 2, ww // 2, 2)
             .max(axis=(3, 5)))

    if bias is not None:
        bb, cc, hh, ww = y.shape
        y = (y.reshape(bb, cc // 8, 8, hh, ww)
             + bias.reshape(1, -1, 1, 1, 1)).reshape(bb, cc, hh, ww)
    return y


if __name__ == "__main__":
    key = jax.random.PRNGKey(0)
    kx, kwt = jax.random.split(key)

    in_channels, out_channels = 2, 2
    B, H, W = 2, 8, 8

    x = jax.random.normal(kx, (B, in_channels * 8, H, W), dtype=jnp.float32)
    weight = (jax.random.normal(kwt, (out_channels, in_channels, 8, 3, 3),
                                dtype=jnp.float32)
              / math.sqrt(8 * in_channels * 9 / 2))

    out = jax.block_until_ready(d4_3x3_forward(x, weight))

    # Reference: same expanded weight through XLA's conv.
    w_full = expand_d4_weight(weight)
    ref = jax.lax.conv_general_dilated(
        x, w_full, window_strides=(1, 1), padding=((1, 1), (1, 1)),
        dimension_numbers=("NCHW", "OIHW", "NCHW"))

    assert out.shape == (B, out_channels * 8, H, W)
    assert jnp.allclose(out, ref, atol=5e-2, rtol=5e-2), "mismatch vs reference"
    print("KERNEL_OK")
</pallas_src>

<mosaic_0001>
module attributes {stable_mosaic.version = 11 : i64} {
  func.func @_matmul_kernel(%arg0: i32, %arg1: i32, %arg2: i32, %arg3: memref<128x256xf32, #tpu.memory_space<vmem>>, %arg4: memref<256x128xf32, #tpu.memory_space<vmem>>, %arg5: memref<128x128xf32, #tpu.memory_space<vmem>>, %arg6: memref<128x128xf32, #tpu.memory_space<vmem>>) attributes {dimension_semantics = [#tpu.dimension_semantics<parallel>, #tpu.dimension_semantics<parallel>, #tpu.dimension_semantics<arbitrary>], iteration_bounds = array<i64: 1, 1, 1>, scalar_prefetch = 0 : i64, scratch_operands = 1 : i64, tpu.core_type = #tpu.core_type<tc>, window_params = [{transform_indices = @transform_0, window_bounds = array<i64: 128, 256>}, {transform_indices = @transform_1, window_bounds = array<i64: 256, 128>}, {transform_indices = @transform_2, window_bounds = array<i64: 128, 128>}]} {
    %c0_i32 = arith.constant 0 : i32
    %0 = arith.cmpi eq, %arg2, %c0_i32 : i32
    %1 = arith.extui %0 : i1 to i32
    %c0_i32_0 = arith.constant 0 : i32
    %2 = arith.cmpi ne, %1, %c0_i32_0 : i32
    scf.if %2 {
      %cst_10 = arith.constant 0.000000e+00 : f32
      %12 = vector.broadcast %cst_10 : f32 to vector<128x128xf32>
      %c0_11 = arith.constant 0 : index
      %c0_12 = arith.constant 0 : index
      %13 = vector.load %arg6[%c0_11, %c0_12] : memref<128x128xf32, #tpu.memory_space<vmem>>, vector<128x128xf32>
      tpu.vector_store %arg6[%c0_11, %c0_12], %12 {strides = array<i32>} : memref<128x128xf32, #tpu.memory_space<vmem>>, vector<128x128xf32>,
    } else {
    }
    %c0 = arith.constant 0 : index
    %c0_1 = arith.constant 0 : index
    %3 = vector.load %arg6[%c0, %c0_1] : memref<128x128xf32, #tpu.memory_space<vmem>>, vector<128x128xf32>
    %c0_2 = arith.constant 0 : index
    %c0_3 = arith.constant 0 : index
    %4 = vector.load %arg3[%c0_2, %c0_3] : memref<128x256xf32, #tpu.memory_space<vmem>>, vector<128x256xf32>
    %c0_4 = arith.constant 0 : index
    %c0_5 = arith.constant 0 : index
    %5 = vector.load %arg4[%c0_4, %c0_5] : memref<256x128xf32, #tpu.memory_space<vmem>>, vector<256x128xf32>
    %cst = arith.constant dense<0.000000e+00> : vector<128x128xf32>
    %6 = tpu.matmul %4, %5, %cst {dimension_numbers = #tpu.dot_dimension_numbers<[1], [0], [0], [1], [0, 0, 1, 1], [], []>} : vector<128x256xf32>, vector<256x128xf32>, vector<128x128xf32> -> vector<128x128xf32>
    %7 = arith.addf %3, %6 : vector<128x128xf32>
    %c0_6 = arith.constant 0 : index
    %c0_7 = arith.constant 0 : index
    %8 = vector.load %arg6[%c0_6, %c0_7] : memref<128x128xf32, #tpu.memory_space<vmem>>, vector<128x128xf32>
    tpu.vector_store %arg6[%c0_6, %c0_7], %7 {strides = array<i32>} : memref<128x128xf32, #tpu.memory_space<vmem>>, vector<128x128xf32>,
    %c0_i32_8 = arith.constant 0 : i32
    %9 = arith.cmpi eq, %arg2, %c0_i32_8 : i32
    %10 = arith.extui %9 : i1 to i32
    %c0_i32_9 = arith.constant 0 : i32
    %11 = arith.cmpi ne, %10, %c0_i32_9 : i32
    scf.if %11 {
      %c0_10 = arith.constant 0 : index
      %c0_11 = arith.constant 0 : index
      %12 = vector.load %arg6[%c0_10, %c0_11] : memref<128x128xf32, #tpu.memory_space<vmem>>, vector<128x128xf32>
      %c0_12 = arith.constant 0 : index
      %c0_13 = arith.constant 0 : index
      %13 = vector.load %arg5[%c0_12, %c0_13] : memref<128x128xf32, #tpu.memory_space<vmem>>, vector<128x128xf32>
      tpu.vector_store %arg5[%c0_12, %c0_13], %12 {strides = array<i32>} : memref<128x128xf32, #tpu.memory_space<vmem>>, vector<128x128xf32>,
    } else {
    }
    return
  }
  func.func @transform_0(%arg0: i32, %arg1: i32, %arg2: i32) -> (i32, i32) {
    %c0_i32 = arith.constant 0 : i32
    return %arg0, %arg2 : i32, i32
  }
  func.func @transform_1(%arg0: i32, %arg1: i32, %arg2: i32) -> (i32, i32) {
    %c0_i32 = arith.constant 0 : i32
    return %arg2, %arg1 : i32, i32
  }
  func.func @transform_2(%arg0: i32, %arg1: i32, %arg2: i32) -> (i32, i32) {
    %c0_i32 = arith.constant 0 : i32
    return %arg0, %arg1 : i32, i32
  }
}

</mosaic_0001>

<bundles_post_ra>
// kernel: tpu_custom_call.1
= control target key start
LH: loop header
LB: loop body
LE: loop exit
PB: predicated region body
PF: predicated region fallthrough
CT: control target
= control target key end

     0   :  { %7 = vsyncpa [#allocation4], 0  ;;  %s592_s0 = inlined_call_operand.hbm [shape: f32[128,256], index: 0, kind: input, shape index: {}]   ;;  %s593_s1 = inlined_call_operand.hbm [shape: f32[256,128], index: 1, kind: input, shape index: {}]   ;;  %s594_s2 = inlined_call_operand.hbm [shape: f32[128,128], index: 2, kind: output, shape index: {}]  }
   0x1   :  { %8 = vsyncpa [#allocation7], 0 }
   0x2   :  { %9 = vsyncpa [#allocation5], 0  ;;  %s555_s9 = smov [#allocation3]  }
   0x3   :  { %s15_s10 = sshll.u32 %s555_s9, 4  ;;  %s16_s10 = int_to_ptr.vmem [resolvable:$true] %s15_s10 }
   0x4   :  { %s497_s11 = scalar_lea.vmem %s16_s10, 4096  ;;  %p502_p1 = scmp.lt.s32.totalorder %s16_s10, %s16_s10 }
   0x5   :  { %p498_p0 = scmp.ne.s32.totalorder %s16_s10, %s497_s11  ;;  %p503_p2 = scmp.lt.s32.totalorder %s497_s11, %s497_s11 }
   0x7   :  { %p504_p3 = por %p503_p2, %p502_p1 }
   0x9   :  { %p505_p4 = pnand %p504_p3, %p498_p0 }
   0xb   :  { %508 = shalt.err (!%p505_p4)
}
   0xc   :  { %s556_s12 = smov 256   ;;  %s557_s13 = smov 16  }
   0xd   :  { %21 = dma.hbm_to_vmem [thread:$0]  %s592_s0, 4096, %s16_s10, [#allocation4], %s556_s12, %s556_s12, %s557_s13  }
   0xe   :  { %s558_s16 = smov [#allocation6]  }
   0xf   :  { %s27_s17 = sshll.u32 %s558_s16, 4  ;;  %s28_s17 = int_to_ptr.vmem [resolvable:$true] %s27_s17 }
  0x10   :  { %s517_s18 = scalar_lea.vmem %s28_s17, 4096  ;;  %p522_p6 = scmp.lt.s32.totalorder %s28_s17, %s28_s17 }
  0x11   :  { %p518_p5 = scmp.ne.s32.totalorder %s28_s17, %s517_s18  ;;  %p523_p7 = scmp.lt.s32.totalorder %s517_s18, %s517_s18 }
  0x13   :  { %p524_p8 = por %p523_p7, %p522_p6 }
  0x15   :  { %p525_p9 = pnand %p524_p8, %p518_p5 }
  0x17   :  { %528 = shalt.err (!%p525_p9)
}
  0x18   :  { %s559_s19 = smov 128   ;;  %s560_s20 = smov 8  }
  0x19   :  { %33 = dma.hbm_to_vmem [thread:$0]  %s593_s1, 4096, %s28_s17, [#allocation7], %s559_s19, %s559_s19, %s560_s20  }
  0x1a   :  { %549 = dma.done.wait [#allocation4], 4096  }
  0x1b   :  { %550 = vsyncadd [#allocation4], 4294963200 }
  0x1c   :  { %551 = dma.done.wait [#allocation7], 4096  }
  0x1d   :  { %552 = vsyncadd [#allocation7], 4294963200  ;;  %v139_v0 = vld [vmem:[#allocation6 + $0xf8] sm:$0xff]  ;;  %v138_v2 = vld [vmem:[#allocation6 + $0xf0] sm:$0xff]  ;;  %s561_s0 = smov [#allocation8]  }
  0x1e   :  { %v123_v1 = vld [vmem:[#allocation6 + $0x78] sm:$0xff]  ;;  %370 = vmatprep.subr.mxu0 %v139_v0  ;;  %450 = vmatprep.subr.mxu1 %v139_v0  ;;  %v122_v3 = vld [vmem:[#allocation6 + $0x70] sm:$0xff]  ;;  %v137_v4 = vld [vmem:[#allocation6 + $0xe8] sm:$0xff]  ;;  %s357_s1 = sshll.u32 %s561_s0, 4  ;;  %s358_s1 = int_to_ptr.vmem [resolvable:$true] %s357_s1 }
  0x1f   :  { %371 = vmatpush3.msra.mxu0 %v123_v1  ;;  %466 = vmatpush3.msra.mxu1 %v123_v1  ;;  %v121_v5 = vld [vmem:[#allocation6 + $0x68] sm:$0xff]  ;;  %v136_v6 = vld [vmem:[#allocation6 + $0xe0] sm:$0xff]  ;;  %v135_v8 = vld [vmem:[#allocation6 + $0xd8] sm:$0xff]  ;;  %s529_s23 = scalar_lea.vmem %s358_s1, 2048  ;;  %p534_p11 = scmp.lt.s32.totalorder %s358_s1, %s358_s1 }
  0x20   :  { %372 = vmatprep.subr.mxu0 %v138_v2  ;;  %451 = vmatprep.subr.mxu1 %v138_v2  ;;  %v120_v7 = vld [vmem:[#allocation6 + $0x60] sm:$0xff]  ;;  %v119_v9 = vld [vmem:[#allocation6 + $0x58] sm:$0xff]  ;;  %v134_v10 = vld [vmem:[#allocation6 + $0xd0] sm:$0xff]  ;;  %p530_p10 = scmp.ne.s32.totalorder %s358_s1, %s529_s23  ;;  %p535_p12 = scmp.lt.s32.totalorder %s529_s23, %s529_s23 }
  0x21   :  { %373 = vmatpush3.msra.mxu0 %v122_v3  ;;  %467 = vmatpush3.msra.mxu1 %v122_v3  ;;  %v118_v11 = vld [vmem:[#allocation6 + $0x50] sm:$0xff]  ;;  %v133_v12 = vld [vmem:[#allocation6 + $0xc8] sm:$0xff]  ;;  %v132_v14 = vld [vmem:[#allocation6 + $0xc0] sm:$0xff] }
  0x22   :  { %374 = vmatprep.subr.mxu0 %v137_v4  ;;  %452 = vmatprep.subr.mxu1 %v137_v4  ;;  %v117_v13 = vld [vmem:[#allocation6 + $0x48] sm:$0xff]  ;;  %v116_v15 = vld [vmem:[#allocation6 + $0x40] sm:$0xff]  ;;  %v131_v16 = vld [vmem:[#allocation6 + $0xb8] sm:$0xff]  ;;  %p536_p13 = por %p535_p12, %p534_p11 }
  0x23   :  { %375 = vmatpush3.msra.mxu0 %v121_v5  ;;  %468 = vmatpush3.msra.mxu1 %v121_v5  ;;  %v115_v17 = vld [vmem:[#allocation6 + $0x38] sm:$0xff]  ;;  %v130_v18 = vld [vmem:[#allocation6 + $0xb0] sm:$0xff]  ;;  %v129_v20 = vld [vmem:[#allocation6 + $0xa8] sm:$0xff] }
  0x24   :  { %376 = vmatprep.subr.mxu0 %v136_v6  ;;  %453 = vmatprep.subr.mxu1 %v136_v6  ;;  %v114_v19 = vld [vmem:[#allocation6 + $0x30] sm:$0xff]  ;;  %v113_v21 = vld [vmem:[#allocation6 + $0x28] sm:$0xff]  ;;  %v128_v22 = vld [vmem:[#allocation6 + $0xa0] sm:$0xff]  ;;  %p537_p0 = pnand %p536_p13, %p530_p10 }
  0x25   :  { %377 = vmatpush3.msra.mxu0 %v120_v7  ;;  %469 = vmatpush3.msra.mxu1 %v120_v7  ;;  %v112_v23 = vld [vmem:[#allocation6 + $0x20] sm:$0xff]  ;;  %v127_v24 = vld [vmem:[#allocation6 + $0x98] sm:$0xff]  ;;  %v126_v26 = vld [vmem:[#allocation6 + $0x90] sm:$0xff] }
  0x26   :  { %378 = vmatprep.subr.mxu0 %v135_v8  ;;  %454 = vmatprep.subr.mxu1 %v135_v8  ;;  %v111_v25 = vld [vmem:[#allocation6 + $0x18] sm:$0xff]  ;;  %v110_v27 = vld [vmem:[#allocation6 + $0x10] sm:$0xff]  ;;  %v125_v28 = vld [vmem:[#allocation6 + $0x88] sm:$0xff] }
  0x27   :  { %379 = vmatpush3.msra.mxu0 %v119_v9  ;;  %470 = vmatpush3.msra.mxu1 %v119_v9  ;;  %v109_v29 = vld [vmem:[#allocation6 + $0x8] sm:$0xff]  ;;  %v124_v30 = vld [vmem:[#allocation6 + $0x80] sm:$0xff]  ;;  %v79_v36 = vld [vmem:[#allocation3 + $0x18] sm:$0xff] }
  0x28   :  { %380 = vmatprep.subr.mxu0 %v134_v10  ;;  %455 = vmatprep.subr.mxu1 %v134_v10  ;;  %v108_v31 = vld [vmem:[#allocation6] sm:$0xff]  ;;  %v77_v32 = vld [vmem:[#allocation3 + $0x8] sm:$0xff]  ;;  %v95_v37 = vld [vmem:[#allocation3 + $0x98] sm:$0xff] }
  0x29   :  { %381 = vmatpush3.msra.mxu0 %v118_v11  ;;  %471 = vmatpush3.msra.mxu1 %v118_v11  ;;  %v93_v33 = vld [vmem:[#allocation3 + $0x88] sm:$0xff]  ;;  %v76_v34 = vld [vmem:[#allocation3] sm:$0xff]  ;;  %v78_v38 = vld [vmem:[#allocation3 + $0x10] sm:$0xff] }
  0x2a   :  { %382 = vmatprep.subr.mxu0 %v133_v12  ;;  %456 = vmatprep.subr.mxu1 %v133_v12  ;;  %v92_v35 = vld [vmem:[#allocation3 + $0x80] sm:$0xff]  ;;  %v94_v39 = vld [vmem:[#allocation3 + $0x90] sm:$0xff]  ;;  %v81_v40 = vld [vmem:[#allocation3 + $0x28] sm:$0xff] }
  0x2b   :  { %383 = vmatpush3.msra.mxu0 %v117_v13  ;;  %472 = vmatpush3.msra.mxu1 %v117_v13  ;;  %v97_v41 = vld [vmem:[#allocation3 + $0xa8] sm:$0xff]  ;;  %v80_v42 = vld [vmem:[#allocation3 + $0x20] sm:$0xff]  ;;  %v83_v44 = vld [vmem:[#allocation3 + $0x38] sm:$0xff] }
  0x2c   :  { %384 = vmatprep.subr.mxu0 %v132_v14  ;;  %457 = vmatprep.subr.mxu1 %v132_v14  ;;  %v96_v43 = vld [vmem:[#allocation3 + $0xa0] sm:$0xff]  ;;  %v99_v45 = vld [vmem:[#allocation3 + $0xb8] sm:$0xff]  ;;  %v82_v46 = vld [vmem:[#allocation3 + $0x30] sm:$0xff] }
  0x2d   :  { %385 = vmatpush3.msra.mxu0 %v116_v15  ;;  %473 = vmatpush3.msra.mxu1 %v116_v15  ;;  %v98_v47 = vld [vmem:[#allocation3 + $0xb0] sm:$0xff]  ;;  %v85_v48 = vld [vmem:[#allocation3 + $0x48] sm:$0xff]  ;;  %v84_v50 = vld [vmem:[#allocation3 + $0x40] sm:$0xff] }
  0x2e   :  { %386 = vmatprep.subr.mxu0 %v131_v16  ;;  %458 = vmatprep.subr.mxu1 %v131_v16  ;;  %v101_v49 = vld [vmem:[#allocation3 + $0xc8] sm:$0xff]  ;;  %v100_v51 = vld [vmem:[#allocation3 + $0xc0] sm:$0xff]  ;;  %v87_v52 = vld [vmem:[#allocation3 + $0x58] sm:$0xff] }
  0x2f   :  { %387 = vmatpush3.msra.mxu0 %v115_v17  ;;  %474 = vmatpush3.msra.mxu1 %v115_v17  ;;  %v103_v53 = vld [vmem:[#allocation3 + $0xd8] sm:$0xff]  ;;  %v86_v54 = vld [vmem:[#allocation3 + $0x50] sm:$0xff]  ;;  %v89_v56 = vld [vmem:[#allocation3 + $0x68] sm:$0xff] }
  0x30   :  { %388 = vmatprep.subr.mxu0 %v130_v18  ;;  %459 = vmatprep.subr.mxu1 %v130_v18  ;;  %v102_v55 = vld [vmem:[#allocation3 + $0xd0] sm:$0xff]  ;;  %v105_v57 = vld [vmem:[#allocation3 + $0xe8] sm:$0xff]  ;;  %v88_v58 = vld [vmem:[#allocation3 + $0x60] sm:$0xff] }
  0x31   :  { %389 = vmatpush3.msra.mxu0 %v114_v19  ;;  %475 = vmatpush3.msra.mxu1 %v114_v19  ;;  %v104_v59 = vld [vmem:[#allocation3 + $0xe0] sm:$0xff]  ;;  %v91_v60 = vld [vmem:[#allocation3 + $0x78] sm:$0xff]  ;;  %v90_v62 = vld [vmem:[#allocation3 + $0x70] sm:$0xff] }
  0x32   :  { %390 = vmatprep.subr.mxu0 %v129_v20  ;;  %460 = vmatprep.subr.mxu1 %v129_v20  ;;  %v107_v61 = vld [vmem:[#allocation3 + $0xf8] sm:$0xff]  ;;  %v106_v63 = vld [vmem:[#allocation3 + $0xf0] sm:$0xff] }
  0x33   :  { %391 = vmatpush3.msra.mxu0 %v113_v21  ;;  %476 = vmatpush3.msra.mxu1 %v113_v21 }
  0x34   :  { %392 = vmatprep.subr.mxu0 %v128_v22  ;;  %461 = vmatprep.subr.mxu1 %v128_v22 }
  0x35   :  { %393 = vmatpush3.msra.mxu0 %v112_v23  ;;  %477 = vmatpush3.msra.mxu1 %v112_v23 }
  0x36   :  { %394 = vmatprep.subr.mxu0 %v127_v24  ;;  %462 = vmatprep.subr.mxu1 %v127_v24 }
  0x37   :  { %395 = vmatpush3.msra.mxu0 %v111_v25  ;;  %478 = vmatpush3.msra.mxu1 %v111_v25 }
  0x38   :  { %396 = vmatprep.subr.mxu0 %v126_v26  ;;  %463 = vmatprep.subr.mxu1 %v126_v26 }
  0x39   :  { %397 = vmatpush3.msra.mxu0 %v110_v27  ;;  %479 = vmatpush3.msra.mxu1 %v110_v27 }
  0x3a   :  { %398 = vmatprep.subr.mxu0 %v125_v28  ;;  %464 = vmatprep.subr.mxu1 %v125_v28 }
  0x3b   :  { %399 = vmatpush3.msra.mxu0 %v109_v29  ;;  %480 = vmatpush3.msra.mxu1 %v109_v29 }
  0x3c   :  { %400 = vmatprep.subr.mxu0 %v124_v30  ;;  %465 = vmatprep.subr.mxu1 %v124_v30 }
  0x3d   :  { %401 = vmatpush3.msra.mxu0 %v108_v31  ;;  %481 = vmatpush3.msra.mxu1 %v108_v31 }
  0x3e   :  { %204 = vmatprep.mubr.f32.mxu0 %v77_v32  ;;  %244 = vmatprep.mubr.f32.mxu1 %v93_v33 }
  0x3f   :  { %205 = vmatmul.mubr.f32.vlgmr.msra.gmra.mxu0 %v76_v34  ;;  %245 = vmatmul.mubr.f32.vlgmr.msra.gmra.mxu1 %v92_v35 }
  0x40   :  { %209 = vmatprep.mubr.f32.mxu0 %v79_v36  ;;  %249 = vmatprep.mubr.f32.mxu1 %v95_v37 }
  0x43   :  { %210 = vmatmul.mubr.f32.gmra.mxu0 %v78_v38  ;;  %250 = vmatmul.mubr.f32.gmra.mxu1 %v94_v39 }
  0x44   :  { %214 = vmatprep.mubr.f32.mxu0 %v81_v40  ;;  %254 = vmatprep.mubr.f32.mxu1 %v97_v41 }
  0x47   :  { %215 = vmatmul.mubr.f32.gmra.mxu0 %v80_v42  ;;  %255 = vmatmul.mubr.f32.gmra.mxu1 %v96_v43 }
  0x48   :  { %219 = vmatprep.mubr.f32.mxu0 %v83_v44  ;;  %259 = vmatprep.mubr.f32.mxu1 %v99_v45 }
  0x4b   :  { %220 = vmatmul.mubr.f32.gmra.mxu0 %v82_v46  ;;  %260 = vmatmul.mubr.f32.gmra.mxu1 %v98_v47 }
  0x4c   :  { %224 = vmatprep.mubr.f32.mxu0 %v85_v48  ;;  %264 = vmatprep.mubr.f32.mxu1 %v101_v49 }
  0x4f   :  { %225 = vmatmul.mubr.f32.gmra.mxu0 %v84_v50  ;;  %265 = vmatmul.mubr.f32.gmra.mxu1 %v100_v51 }
  0x50   :  { %229 = vmatprep.mubr.f32.mxu0 %v87_v52  ;;  %269 = vmatprep.mubr.f32.mxu1 %v103_v53 }
  0x53   :  { %230 = vmatmul.mubr.f32.gmra.mxu0 %v86_v54  ;;  %270 = vmatmul.mubr.f32.gmra.mxu1 %v102_v55 }
  0x54   :  { %234 = vmatprep.mubr.f32.mxu0 %v89_v56  ;;  %274 = vmatprep.mubr.f32.mxu1 %v105_v57 }
  0x57   :  { %235 = vmatmul.mubr.f32.gmra.mxu0 %v88_v58  ;;  %275 = vmatmul.mubr.f32.gmra.mxu1 %v104_v59 }
  0x58   :  { %239 = vmatprep.mubr.f32.mxu0 %v91_v60  ;;  %279 = vmatprep.mubr.f32.mxu1 %v107_v61 }
  0x5b   :  { %240 = vmatmul.mubr.f32.gmra.mxu0 %v90_v62  ;;  %280 = vmatmul.mubr.f32.gmra.mxu1 %v106_v63 }
  0xff   :  { %v402_v0 = vpop.f32.mrf.mxu0  ;;  %v426_v1 = vpop.f32.mrf.mxu1 }
 0x101   :  { %v403_v2 = vpop.f32.mrf.mxu0  ;;  %v427_v3 = vpop.f32.mrf.mxu1 }
 0x102   :  { %v404_v4 = vadd.f32 %v403_v2, %v402_v0  ;;  %v428_v5 = vadd.f32 %v427_v3, %v426_v1 }
 0x103   :  { %v405_v6 = vpop.f32.mrf.mxu0  ;;  %v429_v7 = vpop.f32.mrf.mxu1 }
 0x104   :  { %336 = vst [vmem:[#allocation8] sm:$0xff] %v404_v4  ;;  %344 = vst [vmem:[#allocation8 + $0x40] sm:$0xff] %v428_v5 }
 0x105   :  { %v406_v8 = vpop.f32.mrf.mxu0  ;;  %v430_v9 = vpop.f32.mrf.mxu1 }
 0x106   :  { %v407_v10 = vadd.f32 %v406_v8, %v405_v6  ;;  %v431_v11 = vadd.f32 %v430_v9, %v429_v7 }
 0x107   :  { %v408_v12 = vpop.f32.mrf.mxu0  ;;  %v432_v13 = vpop.f32.mrf.mxu1 }
 0x108   :  { %337 = vst [vmem:[#allocation8 + $0x8] sm:$0xff] %v407_v10  ;;  %345 = vst [vmem:[#allocation8 + $0x48] sm:$0xff] %v431_v11 }
 0x109   :  { %v409_v14 = vpop.f32.mrf.mxu0  ;;  %v433_v15 = vpop.f32.mrf.mxu1 }
 0x10a   :  { %v410_v16 = vadd.f32 %v409_v14, %v408_v12  ;;  %v434_v17 = vadd.f32 %v433_v15, %v432_v13 }
 0x10b   :  { %v411_v18 = vpop.f32.mrf.mxu0  ;;  %v435_v19 = vpop.f32.mrf.mxu1 }
 0x10c   :  { %338 = vst [vmem:[#allocation8 + $0x10] sm:$0xff] %v410_v16  ;;  %346 = vst [vmem:[#allocation8 + $0x50] sm:$0xff] %v434_v17 }
 0x10d   :  { %v412_v20 = vpop.f32.mrf.mxu0  ;;  %v436_v21 = vpop.f32.mrf.mxu1 }
 0x10e   :  { %v413_v22 = vadd.f32 %v412_v20, %v411_v18  ;;  %v437_v23 = vadd.f32 %v436_v21, %v435_v19 }
 0x10f   :  { %v414_v24 = vpop.f32.mrf.mxu0  ;;  %v438_v25 = vpop.f32.mrf.mxu1 }
 0x110   :  { %339 = vst [vmem:[#allocation8 + $0x18] sm:$0xff] %v413_v22  ;;  %347 = vst [vmem:[#allocation8 + $0x58] sm:$0xff] %v437_v23 }
 0x111   :  { %v415_v26 = vpop.f32.mrf.mxu0  ;;  %v439_v27 = vpop.f32.mrf.mxu1 }
 0x112   :  { %v416_v28 = vadd.f32 %v415_v26, %v414_v24  ;;  %v440_v29 = vadd.f32 %v439_v27, %v438_v25 }
 0x113   :  { %v417_v30 = vpop.f32.mrf.mxu0  ;;  %v441_v31 = vpop.f32.mrf.mxu1 }
 0x114   :  { %340 = vst [vmem:[#allocation8 + $0x20] sm:$0xff] %v416_v28  ;;  %348 = vst [vmem:[#allocation8 + $0x60] sm:$0xff] %v440_v29 }
 0x115   :  { %v418_v32 = vpop.f32.mrf.mxu0  ;;  %v442_v33 = vpop.f32.mrf.mxu1 }
 0x116   :  { %v419_v34 = vadd.f32 %v418_v32, %v417_v30  ;;  %v443_v35 = vadd.f32 %v442_v33, %v441_v31 }
 0x117   :  { %v420_v36 = vpop.f32.mrf.mxu0  ;;  %v444_v37 = vpop.f32.mrf.mxu1 }
 0x118   :  { %341 = vst [vmem:[#allocation8 + $0x28] sm:$0xff] %v419_v34  ;;  %349 = vst [vmem:[#allocation8 + $0x68] sm:$0xff] %v443_v35 }
 0x119   :  { %v421_v38 = vpop.f32.mrf.mxu0  ;;  %v445_v39 = vpop.f32.mrf.mxu1 }
 0x11a   :  { %v422_v40 = vadd.f32 %v421_v38, %v420_v36  ;;  %v446_v41 = vadd.f32 %v445_v39, %v444_v37 }
 0x11b   :  { %v423_v42 = vpop.f32.mrf.mxu0  ;;  %v447_v43 = vpop.f32.mrf.mxu1 }
 0x11c   :  { %342 = vst [vmem:[#allocation8 + $0x30] sm:$0xff] %v422_v40  ;;  %350 = vst [vmem:[#allocation8 + $0x70] sm:$0xff] %v446_v41 }
 0x11d   :  { %v424_v44 = vpop.f32.mrf.mxu0  ;;  %v448_v45 = vpop.f32.mrf.mxu1 }
 0x11e   :  { %v425_v46 = vadd.f32 %v424_v44, %v423_v42  ;;  %v449_v47 = vadd.f32 %v448_v45, %v447_v43 }
 0x120   :  { %343 = vst [vmem:[#allocation8 + $0x38] sm:$0xff] %v425_v46  ;;  %351 = vst [vmem:[#allocation8 + $0x78] sm:$0xff] %v449_v47 }
 0x121   :  { %540 = shalt.err (!%p537_p0)
}
 0x122   :  { %363 = dma.vmem_to_hbm [thread:$0]  %s358_s1, 2048, %s594_s2, [#allocation5], %s559_s19, %s559_s19, %s560_s20  }
 0x123   :  { %553 = dma.done.wait [#allocation5], 2048  }
 0x124   :  { %554 = vsyncadd [#allocation5], 4294965248 }
 0x125   :  { %367 = vsyncpa [#allocation4], 1 }
 0x126   :  { %368 = vsyncpa [#allocation7], 1 }
 0x127   :  { %369 = vsyncpa [#allocation5], 1 }

</bundles_post_ra>
